<compile_context>
chip_gen: v7x
topology: tpu7x:2x2x1
jax: 0.10.0
libtpu: 0.0.40
codegen_flags: <defaults>
</compile_context>

<pallas_src>
import functools

import jax
import jax.numpy as jnp
from jax.experimental import pallas as pl
from jax.experimental.pallas import tpu as pltpu


def _round_up(x: int, m: int) -> int:
    return ((x + m - 1) // m) * m


def _round_down(x: int, m: int) -> int:
    return (x // m) * m


def _cdiv(a: int, b: int) -> int:
    return -(-a // b)


def _proj_align_kernel(feat_ref, tgt_ref, wt_ref, out_ref, *,
                       normalize: bool, eps: float,
                       total_rows: int, tile_rows: int, mask_tail: bool):
    """Grid = (row-tile,). Each step computes the (negated) sum of per-row cosines of
    its tile and writes one scalar partial; tail rows beyond `total_rows` are masked."""
    # Projection head (bias=False). Weight is pre-transposed to (F, T) in the wrapper,
    # so the MXU contracts the natural layout with no per-step transpose. Operands are
    # fed in their native dtype; accumulation is f32.
    z_pred = jnp.dot(feat_ref[...], wt_ref[...],
                     preferred_element_type=jnp.float32)            # (R, T) f32
    z_ref = tgt_ref[...].astype(jnp.float32)                        # (R, T) f32

    # Per-row reductions only — never divide the (R, T) tiles elementwise.
    dot = jnp.sum(z_pred * z_ref, axis=-1, keepdims=True)           # (R, 1)
    if normalize:
        p2 = jnp.sum(z_pred * z_pred, axis=-1, keepdims=True)       # (R, 1)
        r2 = jnp.sum(z_ref * z_ref, axis=-1, keepdims=True)         # (R, 1)
        # torch.nn.functional.normalize semantics: v / max(||v||, eps)
        # (clamp the norm itself, do NOT fold eps into rsqrt(norm^2 + eps)).
        denom = jnp.maximum(jnp.sqrt(p2), eps) * jnp.maximum(jnp.sqrt(r2), eps)
        cos = dot / denom                                           # O(R) work only
    else:
        cos = dot

    if mask_tail:
        # Ragged last tile: the out-of-bounds rows of the VMEM buffer are undefined
        # (can be garbage / Inf / NaN). jnp.where SELECTS, so NaN in the dead branch
        # cannot poison the sum.
        row0 = pl.program_id(0) * tile_rows
        rows = row0 + jax.lax.broadcasted_iota(jnp.int32, cos.shape, 0)
        cos = jnp.where(rows < total_rows, cos, jnp.float32(0.0))

    # Single cross-lane collapse per tile; negation here, /(B*N) in the wrapper.
    out_ref[...] = (-jnp.sum(cos)).reshape(1, 1, 1)


def projection_alignment_loss(features, targets, weight, *,
                              normalize: bool = True,
                              eps: float = 1e-12,
                              tile_rows: int | None = None,
                              vmem_tile_budget_bytes: int = 24 << 20,
                              vmem_limit_bytes: int = 48 << 20):
    """features: (B, N, F)  targets: (B, N, T)  weight: (T, F) (torch Linear layout).
    Returns scalar f32 loss. Inputs may be f32 or bf16 (no wrapper-side upcast)."""
    B, N, F = features.shape
    T = targets.shape[-1]
    assert targets.shape[:2] == (B, N)
    total = B * N

    feat2 = features.reshape(total, F)
    tgt2 = targets.reshape(total, T)
    wt = weight.T                               # (F, T): transpose once, outside the kernel

    fb = jnp.dtype(features.dtype).itemsize
    tb = jnp.dtype(targets.dtype).itemsize
    wb = jnp.dtype(wt.dtype).itemsize

    # Row granularity: 8 sublanes for 32-bit, more for packed (bf16 -> 16, int8 -> 32).
    g = max(8, 32 // max(1, min(fb, tb)))

    if tile_rows is None:
        # Size the tile so each grid step moves multi-MiB (amortizes ~0.35 us/step) while
        # double-buffered inputs + f32 intermediates stay inside the VMEM budget — sized
        # conservatively so the same choice fits v7x's 64 MiB physical VMEM per TC.
        per_row = 2 * (F * fb + T * tb) + 4 * T * 4   # 2x-buffered inputs + f32 temporaries
        budget = vmem_tile_budget_bytes - 2 * F * T * wb
        tile_rows = max(g, budget // max(per_row, 1))
    # Multiple of the sublane granularity, never over-padding tiny inputs.
    tile_rows = max(g, min(_round_down(tile_rows, g) or g, _round_up(total, g)))

    n_tiles = _cdiv(total, tile_rows)
    mask_tail = (total % tile_rows) != 0

    kernel = functools.partial(_proj_align_kernel, normalize=normalize, eps=eps,
                               total_rows=total, tile_rows=tile_rows,
                               mask_tail=mask_tail)

    cost = pl.CostEstimate(
        flops=2 * total * F * T,
        transcendentals=0,
        bytes_accessed=total * (F * fb + T * tb) + F * T * wb + n_tiles * 4)

    partials = pl.pallas_call(
        kernel,
        out_shape=jax.ShapeDtypeStruct((n_tiles, 1, 1), jnp.float32),
        grid_spec=pltpu.PrefetchScalarGridSpec(
            num_scalar_prefetch=0,
            grid=(n_tiles,),
            in_specs=[
                pl.BlockSpec((tile_rows, F), lambda k: (k, 0)),   # features tile
                pl.BlockSpec((tile_rows, T), lambda k: (k, 0)),   # targets tile
                pl.BlockSpec((F, T), lambda k: (0, 0)),           # resident weight
            ],
            out_specs=pl.BlockSpec((1, 1, 1), lambda k: (k, 0, 0)),  # per-tile partial
        ),
        compiler_params=pltpu.CompilerParams(
            dimension_semantics=("parallel",),        # megacore shards row-tiles on v7x
            vmem_limit_bytes=int(vmem_limit_bytes)),  # lift v5e's 16 MiB scoped default
        cost_estimate=cost,
    )(feat2, tgt2, wt)

    # Partials already carry the minus sign; divide by the TRUE (unpadded) row count.
    return jnp.sum(partials) / jnp.float32(total)


def _reference_loss(features, targets, weight, normalize=True, eps=1e-12):
    """Pure-JAX f32 reference matching the PyTorch forward (mode='feature')."""
    features = features.astype(jnp.float32)
    targets = targets.astype(jnp.float32)
    weight = weight.astype(jnp.float32)
    B = features.shape[0]
    loss = 0.0
    for b in range(B):
        z_pred = features[b] @ weight.T
        z_ref = targets[b]
        if normalize:
            z_pred = z_pred / jnp.maximum(
                jnp.linalg.norm(z_pred, axis=-1, keepdims=True), eps)
            z_ref = z_ref / jnp.maximum(
                jnp.linalg.norm(z_ref, axis=-1, keepdims=True), eps)
        loss += -(z_pred * z_ref).sum(axis=-1).mean()
    return loss / B


if __name__ == "__main__":
    key = jax.random.PRNGKey(0)
    k1, k2, k3, k4, k5, k6, k7, k8, k9 = jax.random.split(key, 9)

    # Case 1: small shapes consistent with the module (batch=2, seq=8, dims=32).
    B, N, FEATURE_DIM, TARGET_DIM = 2, 8, 32, 32
    features = jax.random.normal(k1, (B, N, FEATURE_DIM), dtype=jnp.float32)
    targets = jax.random.normal(k2, (B, N, TARGET_DIM), dtype=jnp.float32)
    # nn.Linear(feature_dim, target_dim, bias=False) default init: U(-1/sqrt(in), 1/sqrt(in)).
    bound = (1.0 / FEATURE_DIM) ** 0.5
    weight = jax.random.uniform(k3, (TARGET_DIM, FEATURE_DIM),
                                dtype=jnp.float32, minval=-bound, maxval=bound)

    loss = jax.block_until_ready(
        projection_alignment_loss(features, targets, weight, normalize=True))
    ref = _reference_loss(features, targets, weight, normalize=True)
    assert jnp.allclose(loss, ref, atol=1e-5, rtol=1e-5), (loss, ref)

    # Case 2: multi-tile + ragged last tile (400 rows, 128-row tiles -> in-kernel masking).
    B2, N2 = 2, 200
    features2 = jax.random.normal(k4, (B2, N2, FEATURE_DIM), dtype=jnp.float32)
    targets2 = jax.random.normal(k5, (B2, N2, TARGET_DIM), dtype=jnp.float32)
    weight2 = jax.random.uniform(k6, (TARGET_DIM, FEATURE_DIM),
                                 dtype=jnp.float32, minval=-bound, maxval=bound)
    loss2 = jax.block_until_ready(
        projection_alignment_loss(features2, targets2, weight2,
                                  normalize=True, tile_rows=128))
    ref2 = _reference_loss(features2, targets2, weight2, normalize=True)
    assert jnp.allclose(loss2, ref2, atol=1e-5, rtol=1e-5), (loss2, ref2)

    # Case 3: bf16 inputs fed to the MXU in native dtype (no wrapper upcast), f32 accumulate.
    B3, N3 = 2, 64
    features3 = jax.random.normal(k7, (B3, N3, FEATURE_DIM)).astype(jnp.bfloat16)
    targets3 = jax.random.normal(k8, (B3, N3, TARGET_DIM)).astype(jnp.bfloat16)
    weight3 = jax.random.uniform(k9, (TARGET_DIM, FEATURE_DIM),
                                 minval=-bound, maxval=bound).astype(jnp.bfloat16)
    loss3 = jax.block_until_ready(
        projection_alignment_loss(features3, targets3, weight3, normalize=True))
    ref3 = _reference_loss(features3, targets3, weight3, normalize=True)
    assert jnp.allclose(loss3, ref3, atol=1e-4, rtol=1e-4), (loss3, ref3)

    print("KERNEL_OK")
</pallas_src>

<mosaic_0001>
module attributes {stable_mosaic.version = 11 : i64} {
  func.func @_proj_align_kernel(%arg0: i32, %arg1: memref<16x32xf32, #tpu.memory_space<vmem>>, %arg2: memref<16x32xf32, #tpu.memory_space<vmem>>, %arg3: memref<32x32xf32, #tpu.memory_space<vmem>>, %arg4: memref<1x1x1xf32, #tpu.memory_space<vmem>>) attributes {dimension_semantics = [#tpu.dimension_semantics<parallel>], iteration_bounds = array<i64: 1>, scalar_prefetch = 0 : i64, scratch_operands = 0 : i64, tpu.core_type = #tpu.core_type<tc>, window_params = [{transform_indices = @transform_0, window_bounds = array<i64: 16, 32>}, {transform_indices = @transform_1, window_bounds = array<i64: 16, 32>}, {pipeline_mode = #tpu.pipeline_mode<synchronous>, transform_indices = @transform_2, window_bounds = array<i64: 32, 32>}, {transform_indices = @transform_3, window_bounds = array<i64: 1, 1, 1>}]} {
    %c0 = arith.constant 0 : index
    %c0_0 = arith.constant 0 : index
    %0 = vector.load %arg1[%c0, %c0_0] : memref<16x32xf32, #tpu.memory_space<vmem>>, vector<16x32xf32>
    %c0_1 = arith.constant 0 : index
    %c0_2 = arith.constant 0 : index
    %1 = vector.load %arg3[%c0_1, %c0_2] : memref<32x32xf32, #tpu.memory_space<vmem>>, vector<32x32xf32>
    %cst = arith.constant dense<0.000000e+00> : vector<16x32xf32>
    %2 = tpu.matmul %0, %1, %cst {dimension_numbers = #tpu.dot_dimension_numbers<[1], [0], [0], [1], [0, 0, 1, 1], [], []>} : vector<16x32xf32>, vector<32x32xf32>, vector<16x32xf32> -> vector<16x32xf32>
    %c0_3 = arith.constant 0 : index
    %c0_4 = arith.constant 0 : index
    %3 = vector.load %arg2[%c0_3, %c0_4] : memref<16x32xf32, #tpu.memory_space<vmem>>, vector<16x32xf32>
    %4 = arith.mulf %2, %3 : vector<16x32xf32>
    %cst_5 = arith.constant dense<0.000000e+00> : vector<16xf32>
    %5 = vector.multi_reduction <add>, %4, %cst_5 [1] : vector<16x32xf32> to vector<16xf32>
    %6 = vector.shape_cast %5 : vector<16xf32> to vector<16x1xf32>
    %7 = arith.mulf %2, %2 : vector<16x32xf32>
    %cst_6 = arith.constant dense<0.000000e+00> : vector<16xf32>
    %8 = vector.multi_reduction <add>, %7, %cst_6 [1] : vector<16x32xf32> to vector<16xf32>
    %9 = vector.shape_cast %8 : vector<16xf32> to vector<16x1xf32>
    %10 = arith.mulf %3, %3 : vector<16x32xf32>
    %cst_7 = arith.constant dense<0.000000e+00> : vector<16xf32>
    %11 = vector.multi_reduction <add>, %10, %cst_7 [1] : vector<16x32xf32> to vector<16xf32>
    %12 = vector.shape_cast %11 : vector<16xf32> to vector<16x1xf32>
    %13 = math.sqrt %9 : vector<16x1xf32>
    %cst_8 = arith.constant 9.99999996E-13 : f32
    %14 = vector.broadcast %cst_8 : f32 to vector<16x1xf32>
    %15 = arith.maximumf %13, %14 : vector<16x1xf32>
    %16 = math.sqrt %12 : vector<16x1xf32>
    %cst_9 = arith.constant 9.99999996E-13 : f32
    %17 = vector.broadcast %cst_9 : f32 to vector<16x1xf32>
    %18 = arith.maximumf %16, %17 : vector<16x1xf32>
    %19 = arith.mulf %15, %18 : vector<16x1xf32>
    %20 = arith.divf %6, %19 : vector<16x1xf32>
    %21 = vector.shape_cast %20 : vector<16x1xf32> to vector<1x16x1xf32>
    %cst_10 = arith.constant dense<0.000000e+00> : vector<1xf32>
    %22 = vector.multi_reduction <add>, %21, %cst_10 [1, 2] : vector<1x16x1xf32> to vector<1xf32>
    %23 = vector.shape_cast %22 : vector<1xf32> to vector<1x1x1xf32>
    %24 = vector.extract %23[0, 0, 0] : f32 from vector<1x1x1xf32>
    %cst_11 = arith.constant 0.000000e+00 : f32
    %25 = arith.subf %cst_11, %24 : f32
    %26 = vector.broadcast %25 : f32 to vector<1x1x1xf32>
    %c0_12 = arith.constant 0 : index
    %c0_13 = arith.constant 0 : index
    %c0_14 = arith.constant 0 : index
    %27 = vector.load %arg4[%c0_12, %c0_13, %c0_14] : memref<1x1x1xf32, #tpu.memory_space<vmem>>, vector<1x1x1xf32>
    tpu.vector_store %arg4[%c0_12, %c0_13, %c0_14], %26 {strides = array<i32>} : memref<1x1x1xf32, #tpu.memory_space<vmem>>, vector<1x1x1xf32>,
    return
  }
  func.func @transform_0(%arg0: i32) -> (i32, i32) {
    %c0_i32 = arith.constant 0 : i32
    %c0_i32_0 = arith.constant 0 : i32
    return %arg0, %c0_i32 : i32, i32
  }
  func.func @transform_1(%arg0: i32) -> (i32, i32) {
    %c0_i32 = arith.constant 0 : i32
    %c0_i32_0 = arith.constant 0 : i32
    return %arg0, %c0_i32 : i32, i32
  }
  func.func @transform_2(%arg0: i32) -> (i32, i32) {
    %c0_i32 = arith.constant 0 : i32
    %c0_i32_0 = arith.constant 0 : i32
    %c0_i32_1 = arith.constant 0 : i32
    return %c0_i32, %c0_i32_0 : i32, i32
  }
  func.func @transform_3(%arg0: i32) -> (i32, i32, i32) {
    %c0_i32 = arith.constant 0 : i32
    %c0_i32_0 = arith.constant 0 : i32
    %c0_i32_1 = arith.constant 0 : i32
    return %arg0, %c0_i32, %c0_i32_0 : i32, i32, i32
  }
}

</mosaic_0001>

<bundles_post_ra>
// kernel: tpu_custom_call.1
= control target key start
LH: loop header
LB: loop body
LE: loop exit
PB: predicated region body
PF: predicated region fallthrough
CT: control target
= control target key end

     0   :  { %8 = vsyncpa [#allocation3], 0  ;;  %s480_s0 = inlined_call_operand.hbm [shape: f32[16,32], index: 0, kind: input, shape index: {}]   ;;  %s481_s1 = inlined_call_operand.hbm [shape: f32[16,32], index: 1, kind: input, shape index: {}]   ;;  %s482_s2 = inlined_call_operand.hbm [shape: f32[32,32], index: 2, kind: input, shape index: {}]   ;;  %s483_s3 = inlined_call_operand.hbm [shape: f32[1,1,1], index: 3, kind: output, shape index: {}]  }
   0x1   :  { %9 = vsyncpa [#allocation6], 0 }
   0x2   :  { %10 = vsyncpa [#allocation4], 0  ;;  %s382_s12 = smov [#allocation5]   ;;  %s383_s14 = smov [#allocation2]  }
   0x3   :  { %s28_s13 = sshll.u32 %s382_s12, 4  ;;  %s16_s15 = sshll.u32 %s383_s14, 4  ;;  %s29_s13 = int_to_ptr.vmem [resolvable:$true] %s28_s13  ;;  %s408_s15 = int_to_ptr.vmem [resolvable:$true] %s16_s15 }
   0x4   :  { %s288_s18 = scalar_lea.hbm %s481_s1, 256 }
   0x5   :  { %p289_p0 = scmp.ne.s32.totalorder %s481_s1, %s288_s18  ;;  %p292_p1 = scmp.lt.u32.totalorder %s288_s18, %s481_s1 }
   0x7   :  { %p294_p2 = pnand %p292_p1, %p289_p0 }
   0x9   :  { %297 = shalt.err (!%p294_p2)
}
   0xa   :  { %s298_s23 = scalar_lea.vmem %s29_s13, 256  ;;  %p303_p4 = scmp.lt.s32.totalorder %s29_s13, %s29_s13 }
   0xb   :  { %p299_p3 = scmp.ne.s32.totalorder %s29_s13, %s298_s23  ;;  %p304_p5 = scmp.lt.s32.totalorder %s298_s23, %s298_s23 }
   0xd   :  { %p305_p6 = por %p304_p5, %p303_p4 }
   0xf   :  { %p306_p7 = pnand %p305_p6, %p299_p3 }
  0x11   :  { %309 = shalt.err (!%p306_p7)
}
  0x12   :  { %s384_s24 = smov 128   ;;  %s385_s25 = smov 8  }
  0x13   :  { %34 = dma.hbm_to_vmem [thread:$0]  %s481_s1, 256, %s29_s13, [#allocation6], %s384_s24, %s384_s24, %s385_s25  }
  0x14   :  { %s310_s30 = scalar_lea.hbm %s480_s0, 256 }
  0x15   :  { %p311_p8 = scmp.ne.s32.totalorder %s480_s0, %s310_s30  ;;  %p314_p9 = scmp.lt.u32.totalorder %s310_s30, %s480_s0 }
  0x17   :  { %p316_p10 = pnand %p314_p9, %p311_p8 }
  0x19   :  { %319 = shalt.err (!%p316_p10)
}
  0x1a   :  { %s320_s8 = scalar_lea.vmem %s408_s15, 256  ;;  %p325_p12 = scmp.lt.s32.totalorder %s408_s15, %s408_s15 }
  0x1b   :  { %p321_p11 = scmp.ne.s32.totalorder %s408_s15, %s320_s8  ;;  %p326_p13 = scmp.lt.s32.totalorder %s320_s8, %s320_s8 }
  0x1d   :  { %p327_p0 = por %p326_p13, %p325_p12 }
  0x1f   :  { %p328_p1 = pnand %p327_p0, %p321_p11 }
  0x21   :  { %331 = shalt.err (!%p328_p1)
}
  0x22   :  { %22 = dma.hbm_to_vmem [thread:$0]  %s480_s0, 256, %s408_s15, [#allocation3], %s384_s24, %s384_s24, %s385_s25  }
  0x23   :  { %s386_s10 = smov [#allocation7]   ;;  %s332_s14 = scalar_lea.hbm %s482_s2, 512 }
  0x24   :  { %s40_s11 = sshll.u32 %s386_s10, 4  ;;  %p333_p2 = scmp.ne.s32.totalorder %s482_s2, %s332_s14  ;;  %s41_s11 = int_to_ptr.vmem [resolvable:$true] %s40_s11 }
  0x25   :  { %p336_p3 = scmp.lt.u32.totalorder %s332_s14, %s482_s2 }
  0x27   :  { %p338_p4 = pnand %p336_p3, %p333_p2 }
  0x29   :  { %341 = shalt.err (!%p338_p4)
}
  0x2a   :  { %s342_s20 = scalar_lea.vmem %s41_s11, 512  ;;  %p347_p6 = scmp.lt.s32.totalorder %s41_s11, %s41_s11 }
  0x2b   :  { %p343_p5 = scmp.ne.s32.totalorder %s41_s11, %s342_s20  ;;  %p348_p7 = scmp.lt.s32.totalorder %s342_s20, %s342_s20 }
  0x2d   :  { %p349_p8 = por %p348_p7, %p347_p6 }
  0x2f   :  { %p350_p9 = pnand %p349_p8, %p343_p5 }
  0x31   :  { %353 = shalt.err (!%p350_p9)
}
  0x32   :  { %46 = dma.hbm_to_vmem [thread:$0]  %s482_s2, 512, %s41_s11, [#allocation6], %s384_s24, %s384_s24, %s385_s25  }
  0x33   :  { %376 = dma.done.wait [#allocation3], 256  }
  0x34   :  { %377 = vsyncadd [#allocation3], 4294967040 }
  0x35   :  { %378 = dma.done.wait [#allocation6], 768  }
  0x36   :  { %379 = vsyncadd [#allocation6], 4294966528  ;;  %vm62_vm0 = vcmask 261120   ;;  %v58_v0 = vld [vmem:[#allocation7] sm:$0xff]  ;;  %v59_v1 = vld [vmem:[#allocation7 + $0x8] sm:$0xff]  ;;  %vm208_vm9 = vcmask 7168  }
  0x37   :  { %v60_v2 = vld [vmem:[#allocation7 + $0x10] sm:$0xff]  ;;  %v260_v3 = vpack.c.bf16 %v59_v1, %v58_v0  ;;  %v61_v4 = vld [vmem:[#allocation7 + $0x18] sm:$0xff]  ;;  %v56_v5 = vld [vmem:[#allocation2] sm:$0xff]  ;;  %s387_s2 = smov [#allocation8]   ;;  %vm223_vm10 = vcmask 0  }
  0x38   :  { %v264_v6 = vpack.c.bf16 %v61_v4, %v60_v2  ;;  %257 = vmatprep.mubr.msk.f32.mxu0 %vm62_vm0, %v56_v5  ;;  %v144_v7 = vld [vmem:[#allocation5] sm:$0xff]  ;;  %v145_v8 = vld [vmem:[#allocation5 + $0x8] sm:$0xff]  ;;  %v57_v13 = vld [vmem:[#allocation2 + $0x8] sm:$0xff]  ;;  %s231_s21 = sshll.u32 %s387_s2, 4  ;;  %s232_s21 = int_to_ptr.vmem [resolvable:$true] %s231_s21 }
  0x39   :  { %261 = vmatprep.subr.bf16.mxu0 %v260_v3  ;;  %v162_v9 = vmul.f32 %v144_v7, %v144_v7  ;;  %v163_v10 = vmul.f32 %v145_v8, %v145_v8  ;;  %s354_s24 = scalar_lea.vmem %s232_s21, 16  ;;  %s358_s25 = scalar_lea.vmem %s232_s21, 32 }
  0x3a   :  { %263 = vmatpush3.bf16.msra.mxu0 %v260_v3  ;;  %p355_p10 = scmp.ne.s32.totalorder %s232_s21, %s354_s24  ;;  %p359_p11 = scmp.lt.s32.totalorder %s232_s21, %s232_s21 }
  0x3b   :  { %265 = vmatprep.subr.bf16.mxu0 %v264_v6  ;;  %v164_v11 = vsel %vm62_vm0, %v162_v9, 0.0  ;;  %v167_v12 = vsel %vm62_vm0, %v163_v10, 0.0  ;;  %p360_p12 = scmp.lt.s32.totalorder %s358_s25, %s354_s24 }
  0x3c   :  { %165 = vadd.xlane.f32.xlu1 %v164_v11 }
  0x3d   :  { %p361_p13 = por %p360_p12, %p359_p11 }
  0x3e   :  { %267 = vmatpush3.bf16.msra.mxu0 %v264_v6 }
  0x3f   :  { %p362_p0 = pnand %p361_p13, %p355_p10 }
  0x40   :  { %168 = vadd.xlane.f32.xlu1 %v167_v12 }
  0x41   :  { %258 = vmatmul.mubr.msk.f32.vlgmr.msra.gmra.mrb[0].mxu0 %vm62_vm0, %v57_v13 }
  0xc9   :  { %v166_v24 = vpop.xlane.xlu1 %165 }
  0xca   :  { %276 = vrsqrt.f32 %v166_v24  ;;  %vm188_vm1 = vcmp.eq.f32.partialorder %v166_v24, inf  ;;  %v191_v31 = vand.u32 2147483648, %v166_v24  ;;  %vm190_vm2 = vcmp.eq.f32.partialorder %v166_v24, 0.0 }
  0xcd   :  { %v169_v25 = vpop.xlane.xlu1 %168 }
  0xce   :  { %278 = vrsqrt.f32 %v169_v25  ;;  %vm195_vm3 = vcmp.eq.f32.partialorder %v169_v25, inf  ;;  %v198_v37 = vand.u32 2147483648, %v169_v25  ;;  %vm197_vm5 = vcmp.eq.f32.partialorder %v169_v25, 0.0 }
  0xd4   :  { %v277_v27 = vpop.eup %276 }
  0xd5   :  { %v187_v29 = vmul.f32 %v277_v27, %v166_v24 }
  0xd7   :  { %v189_v32 = vsel %vm188_vm1, %v166_v24, %v187_v29 }
  0xd8   :  { %v279_v30 = vpop.eup %278  ;;  %v192_v36 = vsel %vm190_vm2, %v191_v31, %v189_v32 }
  0xd9   :  { %v194_v33 = vmul.f32 %v279_v30, %v169_v25  ;;  %v200_v45 = vmax.f32 %v192_v36, 1e-12 }
  0xdb   :  { %v196_v39 = vsel %vm195_vm3, %v169_v25, %v194_v33 }
  0xdc   :  { %v199_v46 = vsel %vm197_vm5, %v198_v37, %v196_v39 }
  0xdd   :  { %v201_v51 = vmax.f32 %v199_v46, 1e-12 }
 0x114   :  { %v259_v14 = vpop.f32.mrb[0].mxu0 }
 0x115   :  { %v147_v15 = vmul.f32 %v259_v14, %v145_v8  ;;  %v135_v16 = vpop.f32.mrb[1].mxu0  ;;  %v155_v19 = vmul.f32 %v259_v14, %v259_v14 }
 0x116   :  { %v154_v17 = vmul.f32 %v135_v16, %v135_v16  ;;  %v146_v21 = vmul.f32 %v144_v7, %v135_v16 }
 0x117   :  { %v151_v18 = vsel %vm62_vm0, %v147_v15, 0.0  ;;  %v159_v22 = vsel %vm62_vm0, %v155_v19, 0.0 }
 0x118   :  { %152 = vadd.xlane.f32.xlu1 %v151_v18  ;;  %v156_v20 = vsel %vm62_vm0, %v154_v17, 0.0  ;;  %v148_v23 = vsel %vm62_vm0, %v146_v21, 0.0 }
 0x119   :  { %157 = vadd.xlane.f32.xlu0 %v156_v20 }
 0x11d   :  { %160 = vadd.xlane.f32.xlu0 %v159_v22 }
 0x121   :  { %149 = vadd.xlane.f32.xlu0 %v148_v23 }
 0x1a5   :  { %v153_v58 = vpop.xlane.xlu1 %152 }
 0x1a6   :  { %v158_v26 = vpop.xlane.xlu0 %157 }
 0x1a7   :  { %280 = vrsqrt.f32 %v158_v26  ;;  %vm172_vm4 = vcmp.eq.f32.partialorder %v158_v26, inf  ;;  %v175_v38 = vand.u32 2147483648, %v158_v26  ;;  %vm174_vm6 = vcmp.eq.f32.partialorder %v158_v26, 0.0 }
 0x1aa   :  { %v161_v28 = vpop.xlane.xlu0 %160 }
 0x1ab   :  { %282 = vrsqrt.f32 %v161_v28  ;;  %vm179_vm7 = vcmp.eq.f32.partialorder %v161_v28, inf  ;;  %v182_v47 = vand.u32 2147483648, %v161_v28  ;;  %vm181_vm8 = vcmp.eq.f32.partialorder %v161_v28, 0.0 }
 0x1ae   :  { %v150_v55 = vpop.xlane.xlu0 %149 }
 0x1b1   :  { %v281_v34 = vpop.eup %280 }
 0x1b2   :  { %v171_v35 = vmul.f32 %v281_v34, %v158_v26 }
 0x1b4   :  { %v173_v40 = vsel %vm172_vm4, %v158_v26, %v171_v35 }
 0x1b5   :  { %v283_v41 = vpop.eup %282  ;;  %v176_v42 = vsel %vm174_vm6, %v175_v38, %v173_v40 }
 0x1b6   :  { %v178_v43 = vmul.f32 %v283_v41, %v161_v28  ;;  %v184_v44 = vmax.f32 %v176_v42, 1e-12 }
 0x1b8   :  { %v180_v48 = vsel %vm179_vm7, %v161_v28, %v178_v43  ;;  %v202_v49 = vmul.f32 %v200_v45, %v184_v44 }
 0x1b9   :  { %v183_v50 = vsel %vm181_vm8, %v182_v47, %v180_v48 }
 0x1ba   :  { %v185_v52 = vmax.f32 %v183_v50, 1e-12  ;;  %284 = vrcp.f32 %v202_v49 }
 0x1bc   :  { %v203_v53 = vmul.f32 %v201_v51, %v185_v52 }
 0x1be   :  { %286 = vrcp.f32 %v203_v53 }
 0x1c4   :  { %v285_v54 = vpop.eup %284 }
 0x1c5   :  { %v205_v56 = vmul.f32 %v285_v54, %v150_v55 }
 0x1c7   :  { %v209_v60 = vsel %vm208_vm9, %v205_v56, 0.0 }
 0x1c8   :  { %v287_v57 = vpop.eup %286 }
 0x1c9   :  { %v207_v59 = vmul.f32 %v287_v57, %v153_v58 }
 0x1cb   :  { %v210_v61 = vsel %vm208_vm9, %v207_v59, 0.0 }
 0x1cc   :  { %v211_v62 = vadd.f32 %v210_v61, %v209_v60 }
 0x1ce   :  { %212 = vadd.xlane.f32.xlu0 %v211_v62 }
 0x25b   :  { %v213_v63 = vpop.xlane.xlu0 %212 }
 0x25c   :  { %v214_v0 = vrot.slane %v213_v63, 4 }
 0x25e   :  { %v215_v1 = vadd.f32 %v214_v0, %v213_v63 }
 0x260   :  { %v216_v2 = vrot.slane %v215_v1, 2 }
 0x262   :  { %v217_v3 = vadd.f32 %v216_v2, %v215_v1 }
 0x264   :  { %v218_v4 = vrot.slane %v217_v3, 1 }
 0x266   :  { %v219_v5 = vadd.f32 %v218_v4, %v217_v3 }
 0x268   :  { %268 = vpush %v219_v5 }
 0x299   :  { %s269_s22 = spop %268 }
 0x29a   :  { %s221_s23 = ssub.f32 0.0, %s269_s22 }
 0x29c   :  { %v222_v6 = vstv %s221_s23 }
 0x29d   :  { %224 = vst.msk [vmem:[#allocation8] sm:$0x1] %vm223_vm10, %v222_v6 }
 0x29e   :  { %365 = shalt.err (!%p362_p0)
}
 0x29f   :  { %s366_s28 = scalar_lea.hbm %s483_s3, 16 }
 0x2a0   :  { %p367_p1 = scmp.ne.s32.totalorder %s483_s3, %s366_s28  ;;  %p370_p2 = scmp.lt.u32.totalorder %s366_s28, %s483_s3 }
 0x2a2   :  { %p372_p3 = pnand %p370_p2, %p367_p1 }
 0x2a4   :  { %375 = shalt.err (!%p372_p3)
}
 0x2a5   :  { %234 = dma.vmem_to_hbm [thread:$0]  %s232_s21, 16, %s483_s3, [#allocation4]  }
 0x2a6   :  { %380 = dma.done.wait [#allocation4], 16  }
 0x2a7   :  { %381 = vsyncadd [#allocation4], 4294967280 }
 0x2a8   :  { %238 = vsyncpa [#allocation3], 1 }
 0x2a9   :  { %239 = vsyncpa [#allocation6], 1 }
 0x2aa   :  { %240 = vsyncpa [#allocation4], 1 }

</bundles_post_ra>
